<compile_context>
chip_gen: v7x
topology: tpu7x:2x2x1
jax: 0.10.0
libtpu: 0.0.40
codegen_flags: <defaults>
</compile_context>

<pallas_src>
import jax
import jax.numpy as jnp
from jax.experimental import pallas as pl
from jax.experimental.pallas import tpu as pltpu


def full3net_kernel(
    x_ref,     # (2, TB)   input, feature-major (batch on lanes)
    w1_ref,    # (H, 2)    linear1.weight
    b1_ref,    # (H, 1)
    w2_ref,    # (H, H)    linear2.weight
    b2_ref,    # (H, 1)
    w3_ref,    # (1, H)    linearoutput.weight
    b3_ref,    # (1, 1)
    out_ref,   # (1, TB)
    hid1_ref,  # (H, TB)
    hid2_ref,  # (H, TB)
):
    x = x_ref[...]                                   # (2, TB)
    w1 = w1_ref[...]                                 # (H, 2)

    # Layer 1: contraction dim is only 2 -> do it on the VPU as broadcast FMAs
    # instead of wasting an MXU push on a K=2 matmul.
    pre1 = w1[:, 0:1] * x[0:1, :] + w1[:, 1:2] * x[1:2, :] + b1_ref[...]
    h1 = jnp.tanh(pre1)                              # (H, TB)

    # Layer 2: (H,H) @ (H,TB) on the MXU, f32 accumulation.
    h2 = jnp.tanh(
        jnp.dot(w2_ref[...], h1, preferred_element_type=jnp.float32) + b2_ref[...]
    )                                                # (H, TB)

    # Output layer: (1,H) @ (H,TB).  Kernel is HBM-bound, the near-empty MXU
    # push is not on the critical path, so keep the dot (matches reference
    # precision exactly).
    logit = jnp.dot(w3_ref[...], h2, preferred_element_type=jnp.float32) + b3_ref[...]
    out_ref[...] = jax.nn.sigmoid(logit)             # (1, TB)

    hid1_ref[...] = h1
    hid2_ref[...] = h2


def _round_up(n, m):
    return ((n + m - 1) // m) * m


def _choose_batch_tile(B, H):
    """Pick a lane-aligned batch tile from a per-generation VMEM budget.

    Returns (tb, vmem_limit_bytes).  Double-buffered hid1/hid2 writebacks
    dominate the per-step working set:
        bytes/step ~= 2 * 4 * tb * (2 + 1 + 2*H)  +  2 * 4 * (weights & biases)
    """
    try:
        vmem_phys = pltpu.get_tpu_info().vmem_capacity_bytes
    except Exception:
        vmem_phys = 64 << 20          # conservative default (v7x-sized VMEM)

    if vmem_phys <= (64 << 20):       # v7x-class: 64 MiB per TC, leave headroom
        budget, vmem_limit = 40 << 20, 48 << 20
    else:                             # v5e / v6e: 128 MiB, use the free VMEM
        budget, vmem_limit = 80 << 20, 96 << 20

    # Per batch-column bytes, f32, 2 pipeline buffers: x(2) + out(1) + 2 hiddens(H each).
    per_col = 2 * 4 * (2 + 1 + 2 * H)
    # Weights / biases (resident via constant index_maps; count 2 buffers to be safe).
    fixed = 2 * 4 * (H * 2 + H + H * H + H + H + 1)

    tb = max(128, ((budget - fixed) // per_col) // 128 * 128)
    tb = min(tb, 16384)                    # diminishing returns past a few MiB/step
    tb = min(tb, _round_up(B, 128))        # never pad the batch beyond one tile
    # Keep >= ~8 grid steps (>= 4 per TC under "parallel" on v7x) when B allows,
    # so each core's pipeline has in-flight work to hide writeback.
    if B >= 8 * 128:
        tb = min(tb, max(128, _round_up(pl.cdiv(B, 8), 128)))
    return tb, vmem_limit


@jax.jit
def full3net_forward(x, params):
    """x: (B, 2) f32.

    Returns (out (B, 1), hid1 (H, B), hid2 (H, B)).
    hid1/hid2 are FEATURE-MAJOR (batch on lanes), exactly as the kernel stores
    them, to avoid re-reading/re-writing the two dominant tensors through an
    XLA transpose; consumers needing (B, H) can transpose lazily.
    """
    B = x.shape[0]
    w1, b1, w2, b2, w3, b3 = (
        params["w1"], params["b1"], params["w2"], params["b2"], params["w3"], params["b3"]
    )
    H = w1.shape[0]

    tb, vmem_limit = _choose_batch_tile(B, H)
    B_pad = _round_up(B, tb)

    # Feature-major input (batch on lanes); zero-pad the batch tail.
    x_t = jnp.pad(x.T, ((0, 0), (0, B_pad - B)))

    const = lambda i: (0, 0)   # weights / biases: fetched once, stay resident

    out_t, hid1_t, hid2_t = pl.pallas_call(
        full3net_kernel,
        out_shape=(
            jax.ShapeDtypeStruct((1, B_pad), jnp.float32),
            jax.ShapeDtypeStruct((H, B_pad), jnp.float32),
            jax.ShapeDtypeStruct((H, B_pad), jnp.float32),
        ),
        grid=(B_pad // tb,),
        in_specs=[
            pl.BlockSpec((2, tb), lambda i: (0, i)),   # x
            pl.BlockSpec((H, 2), const),               # w1
            pl.BlockSpec((H, 1), const),               # b1
            pl.BlockSpec((H, H), const),               # w2
            pl.BlockSpec((H, 1), const),               # b2
            pl.BlockSpec((1, H), const),               # w3
            pl.BlockSpec((1, 1), const),               # b3
        ],
        out_specs=(
            pl.BlockSpec((1, tb), lambda i: (0, i)),   # out  (lane-dense)
            pl.BlockSpec((H, tb), lambda i: (0, i)),   # hid1 (lane-dense)
            pl.BlockSpec((H, tb), lambda i: (0, i)),   # hid2 (lane-dense)
        ),
        compiler_params=pltpu.CompilerParams(
            dimension_semantics=("parallel",),         # shard batch over TCs (v7x)
            vmem_limit_bytes=vmem_limit,
        ),
    )(
        x_t,
        w1, b1.reshape(H, 1),
        w2, b2.reshape(H, 1),
        w3, b3.reshape(1, 1),
    )

    out = out_t[:, :B].T       # (B, 1): tiny, transpose cost negligible
    hid1 = hid1_t[:, :B]       # (H, B): feature-major, no transpose
    hid2 = hid2_t[:, :B]       # (H, B)
    return out, hid1, hid2


def init_params(key, num_hid):
    """Deterministic init matching nn.Linear shapes (PyTorch-style uniform bounds)."""
    H = num_hid
    keys = jax.random.split(key, 6)

    def uni(k, shape, fan_in):
        bound = 1.0 / jnp.sqrt(fan_in)
        return jax.random.uniform(k, shape, jnp.float32, -bound, bound)

    return {
        "w1": uni(keys[0], (H, 2), 2),      # linear1.weight (out, in)
        "b1": uni(keys[1], (H,), 2),        # linear1.bias
        "w2": uni(keys[2], (H, H), H),      # linear2.weight
        "b2": uni(keys[3], (H,), H),        # linear2.bias
        "w3": uni(keys[4], (1, H), H),      # linearoutput.weight
        "b3": uni(keys[5], (1,), H),        # linearoutput.bias
    }


def full3net_ref(x, params):
    """Pure-JAX reference mirroring the PyTorch forward exactly."""
    w1, b1, w2, b2, w3, b3 = (
        params["w1"], params["b1"], params["w2"], params["b2"], params["w3"], params["b3"]
    )
    h1 = jnp.tanh(x @ w1.T + b1)
    h2 = jnp.tanh(h1 @ w2.T + b2)
    out = jax.nn.sigmoid(h2 @ w3.T + b3)
    return out, h1, h2


if __name__ == "__main__":
    num_hid = 32
    batch = 8

    key = jax.random.PRNGKey(0)
    k_x, k_p = jax.random.split(key)
    x = jax.random.normal(k_x, (batch, 2), jnp.float32)
    params = init_params(k_p, num_hid)

    out, hid1_fm, hid2_fm = full3net_forward(x, params)
    out, hid1_fm, hid2_fm = jax.block_until_ready((out, hid1_fm, hid2_fm))

    out_ref, h1_ref, h2_ref = full3net_ref(x, params)
    assert out.shape == (batch, 1)
    assert hid1_fm.shape == (num_hid, batch) and hid2_fm.shape == (num_hid, batch)
    assert jnp.allclose(out, out_ref, atol=1e-5, rtol=1e-5)
    assert jnp.allclose(hid1_fm.T, h1_ref, atol=1e-5, rtol=1e-5)
    assert jnp.allclose(hid2_fm.T, h2_ref, atol=1e-5, rtol=1e-5)

    print("KERNEL_OK")
</pallas_src>

<mosaic_0001>
module attributes {stable_mosaic.version = 11 : i64} {
  func.func @full3net_kernel(%arg0: i32, %arg1: memref<2x128xf32, #tpu.memory_space<vmem>>, %arg2: memref<32x2xf32, #tpu.memory_space<vmem>>, %arg3: memref<32x1xf32, #tpu.memory_space<vmem>>, %arg4: memref<32x32xf32, #tpu.memory_space<vmem>>, %arg5: memref<32x1xf32, #tpu.memory_space<vmem>>, %arg6: memref<1x32xf32, #tpu.memory_space<vmem>>, %arg7: memref<1x1xf32, #tpu.memory_space<vmem>>, %arg8: memref<1x128xf32, #tpu.memory_space<vmem>>, %arg9: memref<32x128xf32, #tpu.memory_space<vmem>>, %arg10: memref<32x128xf32, #tpu.memory_space<vmem>>) attributes {dimension_semantics = [#tpu.dimension_semantics<parallel>], iteration_bounds = array<i64: 1>, scalar_prefetch = 0 : i64, scratch_operands = 0 : i64, tpu.core_type = #tpu.core_type<tc>, window_params = [{transform_indices = @transform_0, window_bounds = array<i64: 2, 128>}, {pipeline_mode = #tpu.pipeline_mode<synchronous>, transform_indices = @transform_1, window_bounds = array<i64: 32, 2>}, {pipeline_mode = #tpu.pipeline_mode<synchronous>, transform_indices = @transform_2, window_bounds = array<i64: 32, 1>}, {pipeline_mode = #tpu.pipeline_mode<synchronous>, transform_indices = @transform_3, window_bounds = array<i64: 32, 32>}, {pipeline_mode = #tpu.pipeline_mode<synchronous>, transform_indices = @transform_4, window_bounds = array<i64: 32, 1>}, {pipeline_mode = #tpu.pipeline_mode<synchronous>, transform_indices = @transform_5, window_bounds = array<i64: 1, 32>}, {pipeline_mode = #tpu.pipeline_mode<synchronous>, transform_indices = @transform_6, window_bounds = array<i64: 1, 1>}, {transform_indices = @transform_7, window_bounds = array<i64: 1, 128>}, {transform_indices = @transform_8, window_bounds = array<i64: 32, 128>}, {transform_indices = @transform_9, window_bounds = array<i64: 32, 128>}]} {
    %c0 = arith.constant 0 : index
    %c0_0 = arith.constant 0 : index
    %0 = vector.load %arg1[%c0, %c0_0] : memref<2x128xf32, #tpu.memory_space<vmem>>, vector<2x128xf32>
    %c0_1 = arith.constant 0 : index
    %c0_2 = arith.constant 0 : index
    %1 = vector.load %arg2[%c0_1, %c0_2] : memref<32x2xf32, #tpu.memory_space<vmem>>, vector<32x2xf32>
    %2 = vector.extract_strided_slice %1 {offsets = [0, 0], sizes = [32, 1], strides = [1, 1]} : vector<32x2xf32> to vector<32x1xf32>
    %3 = vector.extract_strided_slice %0 {offsets = [0, 0], sizes = [1, 128], strides = [1, 1]} : vector<2x128xf32> to vector<1x128xf32>
    %4 = vector.broadcast %2 : vector<32x1xf32> to vector<32x128xf32>
    %5 = vector.broadcast %3 : vector<1x128xf32> to vector<32x128xf32>
    %6 = arith.mulf %4, %5 : vector<32x128xf32>
    %7 = vector.extract_strided_slice %1 {offsets = [0, 1], sizes = [32, 1], strides = [1, 1]} : vector<32x2xf32> to vector<32x1xf32>
    %8 = vector.extract_strided_slice %0 {offsets = [1, 0], sizes = [1, 128], strides = [1, 1]} : vector<2x128xf32> to vector<1x128xf32>
    %9 = vector.broadcast %7 : vector<32x1xf32> to vector<32x128xf32>
    %10 = vector.broadcast %8 : vector<1x128xf32> to vector<32x128xf32>
    %11 = arith.mulf %9, %10 : vector<32x128xf32>
    %12 = arith.addf %6, %11 : vector<32x128xf32>
    %c0_3 = arith.constant 0 : index
    %c0_4 = arith.constant 0 : index
    %13 = vector.load %arg3[%c0_3, %c0_4] : memref<32x1xf32, #tpu.memory_space<vmem>>, vector<32x1xf32>
    %14 = vector.broadcast %13 : vector<32x1xf32> to vector<32x128xf32>
    %15 = arith.addf %12, %14 : vector<32x128xf32>
    %16 = math.tanh %15 : vector<32x128xf32>
    %c0_5 = arith.constant 0 : index
    %c0_6 = arith.constant 0 : index
    %17 = vector.load %arg4[%c0_5, %c0_6] : memref<32x32xf32, #tpu.memory_space<vmem>>, vector<32x32xf32>
    %cst = arith.constant dense<0.000000e+00> : vector<32x128xf32>
    %18 = tpu.matmul %17, %16, %cst {dimension_numbers = #tpu.dot_dimension_numbers<[1], [0], [0], [1], [0, 0, 1, 1], [], []>} : vector<32x32xf32>, vector<32x128xf32>, vector<32x128xf32> -> vector<32x128xf32>
    %c0_7 = arith.constant 0 : index
    %c0_8 = arith.constant 0 : index
    %19 = vector.load %arg5[%c0_7, %c0_8] : memref<32x1xf32, #tpu.memory_space<vmem>>, vector<32x1xf32>
    %20 = vector.broadcast %19 : vector<32x1xf32> to vector<32x128xf32>
    %21 = arith.addf %18, %20 : vector<32x128xf32>
    %22 = math.tanh %21 : vector<32x128xf32>
    %c0_9 = arith.constant 0 : index
    %c0_10 = arith.constant 0 : index
    %23 = vector.load %arg6[%c0_9, %c0_10] : memref<1x32xf32, #tpu.memory_space<vmem>>, vector<1x32xf32>
    %cst_11 = arith.constant dense<0.000000e+00> : vector<1x128xf32>
    %24 = tpu.matmul %23, %22, %cst_11 {dimension_numbers = #tpu.dot_dimension_numbers<[1], [0], [0], [1], [0, 0, 1, 1], [], []>} : vector<1x32xf32>, vector<32x128xf32>, vector<1x128xf32> -> vector<1x128xf32>
    %c0_12 = arith.constant 0 : index
    %c0_13 = arith.constant 0 : index
    %25 = vector.load %arg7[%c0_12, %c0_13] : memref<1x1xf32, #tpu.memory_space<vmem>>, vector<1x1xf32>
    %26 = vector.broadcast %25 : vector<1x1xf32> to vector<1x128xf32>
    %27 = arith.addf %24, %26 : vector<1x128xf32>
    %28 = arith.negf %27 : vector<1x128xf32>
    %29 = math.exp %28 : vector<1x128xf32>
    %cst_14 = arith.constant 1.000000e+00 : f32
    %30 = vector.broadcast %cst_14 : f32 to vector<1x128xf32>
    %31 = arith.addf %30, %29 : vector<1x128xf32>
    %32 = arith.divf %30, %31 : vector<1x128xf32>
    %c0_15 = arith.constant 0 : index
    %c0_16 = arith.constant 0 : index
    %33 = vector.load %arg8[%c0_15, %c0_16] : memref<1x128xf32, #tpu.memory_space<vmem>>, vector<1x128xf32>
    tpu.vector_store %arg8[%c0_15, %c0_16], %32 {strides = array<i32>} : memref<1x128xf32, #tpu.memory_space<vmem>>, vector<1x128xf32>,
    %c0_17 = arith.constant 0 : index
    %c0_18 = arith.constant 0 : index
    %34 = vector.load %arg9[%c0_17, %c0_18] : memref<32x128xf32, #tpu.memory_space<vmem>>, vector<32x128xf32>
    tpu.vector_store %arg9[%c0_17, %c0_18], %16 {strides = array<i32>} : memref<32x128xf32, #tpu.memory_space<vmem>>, vector<32x128xf32>,
    %c0_19 = arith.constant 0 : index
    %c0_20 = arith.constant 0 : index
    %35 = vector.load %arg10[%c0_19, %c0_20] : memref<32x128xf32, #tpu.memory_space<vmem>>, vector<32x128xf32>
    tpu.vector_store %arg10[%c0_19, %c0_20], %22 {strides = array<i32>} : memref<32x128xf32, #tpu.memory_space<vmem>>, vector<32x128xf32>,
    return
  }
  func.func @transform_0(%arg0: i32) -> (i32, i32) {
    %c0_i32 = arith.constant 0 : i32
    %c0_i32_0 = arith.constant 0 : i32
    return %c0_i32, %arg0 : i32, i32
  }
  func.func @transform_1(%arg0: i32) -> (i32, i32) {
    %c0_i32 = arith.constant 0 : i32
    %c0_i32_0 = arith.constant 0 : i32
    %c0_i32_1 = arith.constant 0 : i32
    return %c0_i32, %c0_i32_0 : i32, i32
  }
  func.func @transform_2(%arg0: i32) -> (i32, i32) {
    %c0_i32 = arith.constant 0 : i32
    %c0_i32_0 = arith.constant 0 : i32
    %c0_i32_1 = arith.constant 0 : i32
    return %c0_i32, %c0_i32_0 : i32, i32
  }
  func.func @transform_3(%arg0: i32) -> (i32, i32) {
    %c0_i32 = arith.constant 0 : i32
    %c0_i32_0 = arith.constant 0 : i32
    %c0_i32_1 = arith.constant 0 : i32
    return %c0_i32, %c0_i32_0 : i32, i32
  }
  func.func @transform_4(%arg0: i32) -> (i32, i32) {
    %c0_i32 = arith.constant 0 : i32
    %c0_i32_0 = arith.constant 0 : i32
    %c0_i32_1 = arith.constant 0 : i32
    return %c0_i32, %c0_i32_0 : i32, i32
  }
  func.func @transform_5(%arg0: i32) -> (i32, i32) {
    %c0_i32 = arith.constant 0 : i32
    %c0_i32_0 = arith.constant 0 : i32
    %c0_i32_1 = arith.constant 0 : i32
    return %c0_i32, %c0_i32_0 : i32, i32
  }
  func.func @transform_6(%arg0: i32) -> (i32, i32) {
    %c0_i32 = arith.constant 0 : i32
    %c0_i32_0 = arith.constant 0 : i32
    %c0_i32_1 = arith.constant 0 : i32
    return %c0_i32, %c0_i32_0 : i32, i32
  }
  func.func @transform_7(%arg0: i32) -> (i32, i32) {
    %c0_i32 = arith.constant 0 : i32
    %c0_i32_0 = arith.constant 0 : i32
    return %c0_i32, %arg0 : i32, i32
  }
  func.func @transform_8(%arg0: i32) -> (i32, i32) {
    %c0_i32 = arith.constant 0 : i32
    %c0_i32_0 = arith.constant 0 : i32
    return %c0_i32, %arg0 : i32, i32
  }
  func.func @transform_9(%arg0: i32) -> (i32, i32) {
    %c0_i32 = arith.constant 0 : i32
    %c0_i32_0 = arith.constant 0 : i32
    return %c0_i32, %arg0 : i32, i32
  }
}

</mosaic_0001>

<bundles_post_ra>
// kernel: full3net_forward.1
= control target key start
LH: loop header
LB: loop body
LE: loop exit
PB: predicated region body
PF: predicated region fallthrough
CT: control target
= control target key end

     0   :  { %v454_v0 = vmov 1   ;;  %v455_v5 = vmov 0   ;;  %vm152_vm0 = vcmask 261120   ;;  %v56_v17 = vlaneseq  ;;  %s606_s1 = inlined_call_operand.vmem [shape: f32[32,2], index: 1, kind: input, shape index: {}]   ;;  %s607_s6 = inlined_call_operand.<no memory space> [shape: f32[1,1], index: 6, kind: input, shape index: {}]   ;;  %s608_s2 = inlined_call_operand.vmem [shape: f32[32,1], index: 2, kind: input, shape index: {}]   ;;  %s609_s4 = inlined_call_operand.vmem [shape: f32[32,1], index: 4, kind: input, shape index: {}]   ;;  %s610_s3 = inlined_call_operand.vmem [shape: f32[32,32], index: 3, kind: input, shape index: {}]   ;;  %s611_s0 = inlined_call_operand.vmem [shape: f32[2,128], index: 0, kind: input, shape index: {}]   ;;  %s612_s8 = inlined_call_operand.vmem [shape: f32[32,128], index: 8, kind: output, shape index: {1}]   ;;  %s613_s9 = inlined_call_operand.vmem [shape: f32[32,128], index: 9, kind: output, shape index: {2}]   ;;  %s614_s5 = inlined_call_operand.vmem [shape: f32[1,32], index: 5, kind: input, shape index: {}]   ;;  %s615_s7 = inlined_call_operand.vmem [shape: f32[1,128], index: 7, kind: output, shape index: {0}]  }
   0x1   :  { %430 = vset.pattern.permute.xlu0 %v454_v0  ;;  %428 = vset.pattern.permute.xlu1 %v454_v0  ;;  %v34_v1 = vld [vmem:[%s606_s1 + $0x10] sm:$0xff]  ;;  %v32_v2 = vld [vmem:[%s606_s1] sm:$0xff]  ;;  %v15_v3 = vstv %s607_s6  ;;  %v33_v4 = vld [vmem:[%s606_s1 + $0x8] sm:$0xff]  ;;  %v456_v61 = vmov 0.0|0.0   ;;  %vm457_vm1 = vmmov 0   ;;  %v458_v62 = vmov 0.0  }
   0x2   :  { %73 = vperm.xlu0 %430, %v34_v1   ;;  %65 = vperm.xlu1 %428, %v32_v2   ;;  %16 = vst [vmem:[#allocation2] sm:$0x1] %v15_v3  ;;  %v35_v6 = vld [vmem:[%s606_s1 + $0x18] sm:$0xff]  ;;  %v93_v7 = vld [vmem:[%s608_s2 + $0x8] sm:$0xff]  ;;  %v92_v8 = vld [vmem:[%s608_s2] sm:$0xff]  ;;  %v552_v20 = vshrl.u32 %v56_v17, 7 }
   0x3   :  { %v128_v9 = vld [vmem:[%s609_s4] sm:$0xff]  ;;  %v94_v10 = vld [vmem:[%s608_s2 + $0x10] sm:$0xff]  ;;  %v95_v12 = vld [vmem:[%s608_s2 + $0x18] sm:$0xff]  ;;  %417 = vmatprep.subr.bf16.mxu1 %v456_v61  ;;  %406 = vmatprep.mubr.msk.f32.mxu1 %vm457_vm1, %v458_v62 }
   0x4   :  { %v130_v11 = vld [vmem:[%s609_s4 + $0x10] sm:$0xff]  ;;  %v129_v14 = vld [vmem:[%s609_s4 + $0x8] sm:$0xff]  ;;  %v131_v15 = vld [vmem:[%s609_s4 + $0x18] sm:$0xff]  ;;  %v58_v23 = vsub.s32 0, %v552_v20  ;;  %v82_v24 = vsub.s32 1, %v552_v20 }
   0x5   :  { %v124_v16 = vld [vmem:[%s610_s3] sm:$0xff]  ;;  %v125_v58 = vld [vmem:[%s610_s3 + $0x8] sm:$0xff]  ;;  %v126_v59 = vld [vmem:[%s610_s3 + $0x10] sm:$0xff] }
   0x6   :  { %431 = vset.pattern.permute.xlu0 %v455_v5  ;;  %69 = vperm.xlu1 %428, %v33_v4   ;;  %v31_v25 = vld [vmem:[%s611_s0] sm:$0x3]  ;;  %v127_v60 = vld [vmem:[%s610_s3 + $0x18] sm:$0xff] }
   0x7   :  { %38 = vperm.xlu0 %431, %v32_v2   ;;  %392 = vmatprep.mubr.msk.f32.mxu0 %vm152_vm0, %v124_v16  ;;  %v59_v28 = vrot.slane %v31_v25, %v58_v23  ;;  %v83_v29 = vrot.slane %v31_v25, %v82_v24  ;;  %v254_v17 = vld [vmem:[%s614_s5] sm:$0x1] }
   0x9   :  { %v255_v13 = vld [vmem:[#allocation2] sm:$0x1] }
   0xa   :  { %429 = vset.pattern.permute.xlu1 %v455_v5 }
   0xb   :  { %43 = vperm.xlu0 %431, %v33_v4   ;;  %53 = vperm.xlu1 %429, %v35_v6  }
   0xf   :  { %48 = vperm.xlu0 %431, %v34_v1   ;;  %432 = vset.pattern.permute.xlu1 %v454_v0 }
  0x10   :  { %77 = vperm.xlu1 %432, %v35_v6  }
  0x13   :  { %103 = vperm.xlu0 %431, %v93_v7  }
  0x14   :  { %433 = vset.pattern.permute.xlu1 %v455_v5 }
  0x15   :  { %98 = vperm.xlu1 %433, %v92_v8  }
  0x17   :  { %134 = vperm.xlu0 %431, %v128_v9  }
  0x19   :  { %108 = vperm.xlu1 %433, %v94_v10  }
  0x1b   :  { %144 = vperm.xlu0 %431, %v130_v11  }
  0x1d   :  { %113 = vperm.xlu1 %433, %v95_v12  }
  0x1f   :  { %258 = vperm.xlu0 %431, %v255_v13  }
  0x21   :  { %139 = vperm.xlu1 %433, %v129_v14  }
  0x25   :  { %149 = vperm.xlu1 %433, %v131_v15  }
  0x81   :  { %v66_v18 = vpop.permute.xlu1 %65  ;;  %v74_v19 = vpop.permute.xlu0 %73 }
  0x82   :  { %v84_v35 = vmul.f32 %v83_v29, %v66_v18  ;;  %v86_v42 = vmul.f32 %v83_v29, %v74_v19 }
  0x85   :  { %v70_v21 = vpop.permute.xlu1 %69 }
  0x86   :  { %v39_v22 = vpop.permute.xlu0 %38  ;;  %v85_v32 = vmul.f32 %v83_v29, %v70_v21 }
  0x87   :  { %v60_v33 = vmul.f32 %v59_v28, %v39_v22 }
  0x89   :  { %v88_v40 = vadd.f32 %v84_v35, %v60_v33 }
  0x8a   :  { %v44_v26 = vpop.permute.xlu0 %43  ;;  %v54_v27 = vpop.permute.xlu1 %53 }
  0x8b   :  { %v61_v30 = vmul.f32 %v59_v28, %v44_v26  ;;  %v63_v47 = vmul.f32 %v59_v28, %v54_v27 }
  0x8d   :  { %v89_v36 = vadd.f32 %v85_v32, %v61_v30 }
  0x8e   :  { %v49_v31 = vpop.permute.xlu0 %48 }
  0x8f   :  { %v78_v34 = vpop.permute.xlu1 %77  ;;  %v62_v38 = vmul.f32 %v59_v28, %v49_v31 }
  0x90   :  { %v87_v44 = vmul.f32 %v83_v29, %v78_v34 }
  0x91   :  { %v90_v45 = vadd.f32 %v86_v42, %v62_v38 }
  0x92   :  { %v104_v37 = vpop.permute.xlu0 %103  ;;  %v91_v49 = vadd.f32 %v87_v44, %v63_v47 }
  0x93   :  { %v117_v39 = vadd.f32 %v104_v37, %v89_v36 }
  0x94   :  { %v99_v41 = vpop.permute.xlu1 %98 }
  0x95   :  { %434 = vtanh.f32 %v117_v39  ;;  %v116_v43 = vadd.f32 %v99_v41, %v88_v40 }
  0x96   :  { %v135_v0 = vpop.permute.xlu0 %134 }
  0x97   :  { %436 = vtanh.f32 %v116_v43 }
  0x98   :  { %v109_v46 = vpop.permute.xlu1 %108 }
  0x99   :  { %v118_v48 = vadd.f32 %v109_v46, %v90_v45 }
  0x9a   :  { %v145_v7 = vpop.permute.xlu0 %144 }
  0x9b   :  { %438 = vtanh.f32 %v118_v48 }
  0x9c   :  { %v114_v50 = vpop.permute.xlu1 %113 }
  0x9d   :  { %v119_v51 = vadd.f32 %v114_v50, %v91_v49 }
  0x9e   :  { %v259_v18 = vpop.permute.xlu0 %258 }
  0x9f   :  { %v435_v52 = vpop.eup %434  ;;  %440 = vtanh.f32 %v119_v51  ;;  %v264_v19 = vrot.slane %v259_v18, %v58_v23 }
  0xa0   :  { %346 = vst [vmem:[%s612_s8 + $0x8] sm:$0xff] %v435_v52  ;;  %v140_v63 = vpop.permute.xlu1 %139 }
  0xa1   :  { %v437_v53 = vpop.eup %436 }
  0xa2   :  { %345 = vst [vmem:[%s612_s8] sm:$0xff] %v437_v53  ;;  %v409_v54 = vpack.c.bf16 %v435_v52, %v437_v53 }
  0xa4   :  { %410 = vmatprep.subr.bf16.mxu0 %v409_v54  ;;  %v150_v5 = vpop.permute.xlu1 %149 }
  0xa5   :  { %v439_v55 = vpop.eup %438  ;;  %412 = vmatpush3.bf16.msra.mxu0 %v409_v54 }
  0xa6   :  { %347 = vst [vmem:[%s612_s8 + $0x10] sm:$0xff] %v439_v55 }
  0xa9   :  { %v441_v56 = vpop.eup %440 }
  0xaa   :  { %348 = vst [vmem:[%s612_s8 + $0x18] sm:$0xff] %v441_v56  ;;  %v413_v57 = vpack.c.bf16 %v441_v56, %v439_v55 }
  0xac   :  { %414 = vmatprep.subr.bf16.mxu0 %v413_v57 }
  0xad   :  { %416 = vmatpush3.bf16.msra.mxu0 %v413_v57 }
  0xb0   :  { %393 = vmatmul.mubr.msk.f32.vlgmr.msra.gmra.mrb[0].mxu0 %vm152_vm0, %v125_v58 }
  0xb1   :  { %395 = vmatprep.mubr.msk.f32.mxu0 %vm152_vm0, %v126_v59 }
  0xb4   :  { %396 = vmatmul.mubr.msk.f32.gmra.mrb[2].mxu0 %vm152_vm0, %v127_v60 }
 0x183   :  { %v394_v1 = vpop.f32.mrb[0].mxu0 }
 0x184   :  { %v237_v2 = vadd.f32 %v394_v1, %v140_v63  ;;  %v231_v3 = vpop.f32.mrb[1].mxu0 }
 0x185   :  { %v232_v4 = vadd.f32 %v231_v3, %v135_v0 }
 0x186   :  { %442 = vtanh.f32 %v237_v2 }
 0x187   :  { %444 = vtanh.f32 %v232_v4  ;;  %v397_v6 = vpop.f32.mrb[2].mxu0 }
 0x188   :  { %v247_v8 = vadd.f32 %v397_v6, %v150_v5  ;;  %v241_v9 = vpop.f32.mrb[3].mxu0 }
 0x189   :  { %v242_v10 = vadd.f32 %v241_v9, %v145_v7 }
 0x18a   :  { %446 = vtanh.f32 %v247_v8 }
 0x18b   :  { %448 = vtanh.f32 %v242_v10 }
 0x190   :  { %v443_v11 = vpop.eup %442 }
 0x191   :  { %v445_v12 = vpop.eup %444  ;;  %350 = vst [vmem:[%s613_s9 + $0x8] sm:$0xff] %v443_v11 }
 0x192   :  { %349 = vst [vmem:[%s613_s9] sm:$0xff] %v445_v12  ;;  %v418_v13 = vpack.c.bf16 %v443_v11, %v445_v12 }
 0x194   :  { %v447_v14 = vpop.eup %446  ;;  %419 = vmatpush3.bf16.msra.mxu1 %v418_v13 }
 0x195   :  { %v449_v15 = vpop.eup %448  ;;  %352 = vst [vmem:[%s613_s9 + $0x18] sm:$0xff] %v447_v14  ;;  %420 = vmatprep.subr.bf16.mxu1 %v456_v61 }
 0x196   :  { %351 = vst [vmem:[%s613_s9 + $0x10] sm:$0xff] %v449_v15  ;;  %v421_v16 = vpack.c.bf16 %v447_v14, %v449_v15 }
 0x198   :  { %422 = vmatpush3.bf16.msra.mxu1 %v421_v16 }
 0x19b   :  { %407 = vmatmul.mubr.msk.f32.vlgmr.msra.gmra.mrb[0].mxu1 %vm152_vm0, %v254_v17 }
 0x26e   :  { %v334_v21 = vpop.f32.mrb[0].mxu1 }
 0x26f   :  { %v335_v22 = vadd.f32 %v334_v21, %v264_v19  ;;  %v408_v24 = vpop.f32.mrb[1].mxu1 }
 0x271   :  { %v370_v25 = vmul.f32 -1.442695, %v335_v22 }
 0x273   :  { %450 = vpow2.f32 %v370_v25 }
 0x27d   :  { %v451_v26 = vpop.eup %450 }
 0x27e   :  { %v341_v27 = vadd.f32 1.0, %v451_v26 }
 0x280   :  { %452 = vrcp.f32 %v341_v27 }
 0x28a   :  { %v453_v28 = vpop.eup %452 }
 0x28b   :  { %344 = vst [vmem:[%s615_s7] sm:$0x1] %v453_v28 }

</bundles_post_ra>
